<compile_context>
chip_gen: v5e
topology: v5e:2x2
jax: 0.10.0
libtpu: 0.0.40
codegen_flags: <defaults>
</compile_context>

<pallas_src>
import functools

import jax
import jax.numpy as jnp
import numpy as np
from jax.experimental import pallas as pl
from jax.experimental.pallas import tpu as pltpu

EPS = 1e-4  # BatchNorm2d(eps=0.0001)


def _round_up(x, m):
    return ((x + m - 1) // m) * m


def _pick_tile(total, cap, align=128):
    """Largest divisor of `total` that is a multiple of `align` and <= cap.
    Falls back to the full extent when no aligned divisor exists."""
    best = None
    d = align
    while d <= min(total, cap):
        if total % d == 0:
            best = d
        d += align
    return best if best is not None else total


# ----------------------------------------------------------------------------
# Kernel 1: feature-extractor conv (transposed im2col matmul, bf16 operands,
#           f32 MXU accumulation) + per-tile BatchNorm partial statistics.
# feats layout: (CPs, B*HW) -- channels in sublanes, spatial lane-dense.
# Grid axis is "parallel": every tile writes its own feats block and its own
# partial-stat block (no cross-iteration accumulation) -> megacore-safe.
# ----------------------------------------------------------------------------
def conv_feats_stats_kernel(p_ref, w_ref, b_ref, feat_ref, psum_ref, psq_ref):
    cps = psum_ref.shape[1]
    # (CPs, KP) @ (KP, TM) -> (CPs, TM), f32 accumulation on the MXU.
    acc = jnp.dot(w_ref[...], p_ref[...], preferred_element_type=jnp.float32)
    feats = acc + b_ref[...]                       # bias (CPs,1) broadcast over lanes
    feats_bf = feats.astype(feat_ref.dtype)
    feat_ref[...] = feats_bf                       # lane-dense bf16 store

    # Partial BN stats from the *stored* (bf16-rounded) values so the statistics
    # used by kernel 2 match the features it normalizes exactly.
    f = feats_bf.astype(jnp.float32)
    psum_ref[...] = jnp.sum(f, axis=1, keepdims=True).reshape(1, cps, 1)
    psq_ref[...] = jnp.sum(f * f, axis=1, keepdims=True).reshape(1, cps, 1)


# ----------------------------------------------------------------------------
# Kernel 2: BN finalize (per-b step 0) + ReLU + spatial readout.
# Grid = (B "parallel", HW-tiles "arbitrary"); resident (CPs, N) accumulator.
#   acc[c, n] += sum_s relu(feat[c, s]*inv - mean*inv) * |w_s[n, s]|
#   out[b, n]  = sum_c acc[c, n] * w_f[n, c]            (last spatial step)
# ----------------------------------------------------------------------------
def readout_kernel(psum_ref, psq_ref, feat_ref, ws_ref, wf_ref, out_ref,
                   acc_ref, scale_ref, shift_ref, *, inv_count, eps):
    si = pl.program_id(1)

    @pl.when(si == 0)
    def _():
        # Finalize BatchNorm statistics (per channel), folding the rsqrt so the
        # per-element path is a single multiply-subtract + relu.
        # NOTE: E[x^2]-mean^2 in f32; fine for zero-ish-mean synthetic features,
        # a shifted two-pass variance would be safer on real backbone activations.
        s_tot = jnp.sum(psum_ref[...], axis=0)          # (CPs, 1)
        sq_tot = jnp.sum(psq_ref[...], axis=0)          # (CPs, 1)
        mean = s_tot * inv_count
        ex2 = sq_tot * inv_count
        var = jnp.maximum(ex2 - mean * mean, 0.0)       # biased (training-mode) var
        inv = jax.lax.rsqrt(var + eps)
        scale_ref[...] = inv
        shift_ref[...] = mean * inv
        acc_ref[...] = jnp.zeros_like(acc_ref)

    # ReLU(BatchNorm(x)) on this (channels, spatial-tile) block.
    y = jnp.maximum(
        feat_ref[...].astype(jnp.float32) * scale_ref[...] - shift_ref[...], 0.0)
    y_bf = y.astype(jnp.bfloat16)                       # MXU operand (CPs, TS)
    ws_abs = jnp.abs(ws_ref[...]).astype(jnp.bfloat16)  # torch.abs(w_s) tile (TS, N)

    # Spatial contraction: one MXU dot per step (no per-image Python loop).
    acc_ref[...] += jnp.dot(y_bf, ws_abs, preferred_element_type=jnp.float32)

    @pl.when(si == pl.num_programs(1) - 1)
    def _():
        # * w_f, then sum over channels.  Padded channels carry w_f == 0.
        out_ref[...] = jnp.sum(acc_ref[...] * wf_ref[...], axis=0).reshape(out_ref.shape)


# ----------------------------------------------------------------------------
# Glue
# ----------------------------------------------------------------------------
def im2col_3x3_same_t(x_nchw, k_pad):
    """Transposed im2col: (k_pad, B*H*W), columns ordered (b, h, w) row-major,
    rows ordered c*9 + kh*3 + kw (matches OIHW conv-weight flattening)."""
    B, Cin, H, W = x_nchw.shape
    xp = jnp.pad(x_nchw, ((0, 0), (0, 0), (1, 1), (1, 1)))
    cols = [xp[:, :, kh:kh + H, kw:kw + W] for kh in range(3) for kw in range(3)]
    p = jnp.stack(cols, axis=2)                                   # (B, Cin, 9, H, W)
    p = p.transpose(1, 2, 0, 3, 4).reshape(Cin * 9, B * H * W)    # (K, M)
    if k_pad > Cin * 9:
        p = jnp.pad(p, ((0, k_pad - Cin * 9), (0, 0)))
    return p


def model_forward(x_nchw, conv_w, conv_b, w_s, w_f, n_neurons):
    B, Cin, H, W = x_nchw.shape
    Cout = conv_w.shape[0]
    HW = H * W
    M = B * HW
    K = Cin * 9
    KP = _round_up(K, 32)                  # sublane-multiple contraction dim
    CPs = _round_up(Cout, 16)              # bf16 sublane packing (NOT 128-lane padding)

    TM = _pick_tile(M, 8192)               # kernel-1 column tile (lane-dense)
    num_tiles = M // TM

    # --- kernel 1 inputs (bf16 MXU operands, zero-padded) ---
    patches_t = im2col_3x3_same_t(x_nchw, KP).astype(jnp.bfloat16)            # (KP, M)
    w2d_t = jnp.pad(conv_w.reshape(Cout, K),
                    ((0, CPs - Cout), (0, KP - K))).astype(jnp.bfloat16)       # (CPs, KP)
    b2d = jnp.pad(conv_b.reshape(Cout, 1),
                  ((0, CPs - Cout), (0, 0))).astype(jnp.float32)               # (CPs, 1)

    feats, psum, psq = pl.pallas_call(
        conv_feats_stats_kernel,
        out_shape=(jax.ShapeDtypeStruct((CPs, M), jnp.bfloat16),
                   jax.ShapeDtypeStruct((num_tiles, CPs, 1), jnp.float32),
                   jax.ShapeDtypeStruct((num_tiles, CPs, 1), jnp.float32)),
        grid=(num_tiles,),
        in_specs=[pl.BlockSpec((KP, TM), lambda i: (0, i)),
                  pl.BlockSpec((CPs, KP), lambda i: (0, 0)),
                  pl.BlockSpec((CPs, 1), lambda i: (0, 0))],
        out_specs=(pl.BlockSpec((CPs, TM), lambda i: (0, i)),
                   pl.BlockSpec((1, CPs, 1), lambda i: (i, 0, 0)),
                   pl.BlockSpec((1, CPs, 1), lambda i: (i, 0, 0))),
        compiler_params=pltpu.CompilerParams(
            dimension_semantics=("parallel",),          # per-tile partials -> megacore-safe
            vmem_limit_bytes=32 * 1024 * 1024),
    )(patches_t, w2d_t, b2d)

    # --- kernel 2 inputs (layout plumbing only: transpose/pad, abs stays in-kernel) ---
    ws_t = w_s.reshape(n_neurons, HW).T.astype(jnp.float32)                   # (HW, N)
    wf_t = jnp.pad(w_f.reshape(n_neurons, Cout),
                   ((0, 0), (0, CPs - Cout))).T.astype(jnp.float32)            # (CPs, N)

    TS = _pick_tile(HW, 4096)              # kernel-2 spatial reduction tile
    num_s = HW // TS

    kernel2 = functools.partial(readout_kernel, inv_count=1.0 / M, eps=EPS)
    out = pl.pallas_call(
        kernel2,
        out_shape=jax.ShapeDtypeStruct((B, 1, n_neurons), jnp.float32),
        grid=(B, num_s),
        in_specs=[pl.BlockSpec((num_tiles, CPs, 1), lambda b, si: (0, 0, 0)),
                  pl.BlockSpec((num_tiles, CPs, 1), lambda b, si: (0, 0, 0)),
                  pl.BlockSpec((CPs, TS), lambda b, si: (0, b * num_s + si)),
                  pl.BlockSpec((TS, n_neurons), lambda b, si: (si, 0)),
                  pl.BlockSpec((CPs, n_neurons), lambda b, si: (0, 0))],
        out_specs=pl.BlockSpec((1, 1, n_neurons), lambda b, si: (b, 0, 0)),
        scratch_shapes=[pltpu.VMEM((CPs, n_neurons), jnp.float32),   # readout accumulator
                        pltpu.VMEM((CPs, 1), jnp.float32),           # inv_std
                        pltpu.VMEM((CPs, 1), jnp.float32)],          # mean * inv_std
        compiler_params=pltpu.CompilerParams(
            dimension_semantics=("parallel", "arbitrary"),  # batch ||, HW reduction
            vmem_limit_bytes=32 * 1024 * 1024),
    )(psum, psq, feats, ws_t, wf_t)

    return out.reshape(B, n_neurons, 1, 1)               # matches torch output (B, N, 1, 1)


# Pure-JAX f32 reference of the same forward (correctness sanity check).
def reference_forward(x_nchw, conv_w, conv_b, w_s, w_f, n_neurons):
    feat = jax.lax.conv_general_dilated(
        x_nchw, conv_w, (1, 1), 'SAME',
        dimension_numbers=('NCHW', 'OIHW', 'NCHW')) + conv_b.reshape(1, -1, 1, 1)
    mean = feat.mean(axis=(0, 2, 3), keepdims=True)
    var = ((feat - mean) ** 2).mean(axis=(0, 2, 3), keepdims=True)
    y = jnp.maximum((feat - mean) / jnp.sqrt(var + EPS), 0.0)
    B, C, H, W = y.shape
    y = y.reshape(B, C, H * W).transpose(0, 2, 1)                 # (B, HW, C)
    ws = jnp.abs(w_s).reshape(n_neurons, H * W)
    t = jnp.einsum('ns,bsc->bnc', ws, y)
    out = jnp.sum(t * w_f.reshape(1, n_neurons, C), axis=-1)
    return out.reshape(B, n_neurons, 1, 1)


if __name__ == "__main__":
    key = jax.random.PRNGKey(0)
    k1, k2, k3, k4, k5 = jax.random.split(key, 5)

    B, Cin, H, W = 2, 3, 16, 16     # small stand-in for (1, 3, 224, 224)
    Cout = 8                        # mod_shape[1]
    N_NEURONS = 4

    x = jax.random.normal(k1, (B, Cin, H, W), jnp.float32)
    conv_w = 0.1 * jax.random.normal(k2, (Cout, Cin, 3, 3), jnp.float32)
    conv_b = 0.1 * jax.random.normal(k3, (Cout,), jnp.float32)
    w_s = jax.random.normal(k4, (N_NEURONS, 1, H * W, 1), jnp.float32)   # torch randn init
    w_f = jax.random.normal(k5, (1, N_NEURONS, 1, Cout), jnp.float32)

    fwd = jax.jit(model_forward, static_argnums=(5,))
    out = fwd(x, conv_w, conv_b, w_s, w_f, N_NEURONS)
    out = jax.block_until_ready(out)

    ref = reference_forward(x, conv_w, conv_b, w_s, w_f, N_NEURONS)
    ref_np = np.asarray(ref)
    out_np = np.asarray(out)
    # bf16 MXU operands + bf16 feature storage -> compare at bf16-appropriate tolerance
    # against the pure-f32 reference.
    atol = 5e-2 * (float(np.abs(ref_np).max()) + 1.0)
    np.testing.assert_allclose(out_np, ref_np, rtol=5e-2, atol=atol)
    print("KERNEL_OK")
</pallas_src>

<mosaic_0001>
module attributes {stable_mosaic.version = 11 : i64} {
  func.func @conv_feats_stats_kernel(%arg0: i32, %arg1: memref<32x512xbf16, #tpu.memory_space<vmem>>, %arg2: memref<16x32xbf16, #tpu.memory_space<vmem>>, %arg3: memref<16x1xf32, #tpu.memory_space<vmem>>, %arg4: memref<16x512xbf16, #tpu.memory_space<vmem>>, %arg5: memref<1x16x1xf32, #tpu.memory_space<vmem>>, %arg6: memref<1x16x1xf32, #tpu.memory_space<vmem>>) attributes {dimension_semantics = [#tpu.dimension_semantics<parallel>], iteration_bounds = array<i64: 1>, scalar_prefetch = 0 : i64, scratch_operands = 0 : i64, tpu.core_type = #tpu.core_type<tc>, window_params = [{transform_indices = @transform_0, window_bounds = array<i64: 32, 512>}, {pipeline_mode = #tpu.pipeline_mode<synchronous>, transform_indices = @transform_1, window_bounds = array<i64: 16, 32>}, {pipeline_mode = #tpu.pipeline_mode<synchronous>, transform_indices = @transform_2, window_bounds = array<i64: 16, 1>}, {transform_indices = @transform_3, window_bounds = array<i64: 16, 512>}, {transform_indices = @transform_4, window_bounds = array<i64: 1, 16, 1>}, {transform_indices = @transform_5, window_bounds = array<i64: 1, 16, 1>}]} {
    %c0 = arith.constant 0 : index
    %c0_0 = arith.constant 0 : index
    %0 = vector.load %arg2[%c0, %c0_0] : memref<16x32xbf16, #tpu.memory_space<vmem>>, vector<16x32xbf16>
    %c0_1 = arith.constant 0 : index
    %c0_2 = arith.constant 0 : index
    %1 = vector.load %arg1[%c0_1, %c0_2] : memref<32x512xbf16, #tpu.memory_space<vmem>>, vector<32x512xbf16>
    %cst = arith.constant dense<0.000000e+00> : vector<16x512xf32>
    %2 = tpu.matmul %0, %1, %cst {dimension_numbers = #tpu.dot_dimension_numbers<[1], [0], [0], [1], [0, 0, 1, 1], [], []>} : vector<16x32xbf16>, vector<32x512xbf16>, vector<16x512xf32> -> vector<16x512xf32>
    %c0_3 = arith.constant 0 : index
    %c0_4 = arith.constant 0 : index
    %3 = vector.load %arg3[%c0_3, %c0_4] : memref<16x1xf32, #tpu.memory_space<vmem>>, vector<16x1xf32>
    %4 = vector.broadcast %3 : vector<16x1xf32> to vector<16x512xf32>
    %5 = arith.addf %2, %4 : vector<16x512xf32>
    %6 = arith.truncf %5 : vector<16x512xf32> to vector<16x512xbf16>
    %c0_5 = arith.constant 0 : index
    %c0_6 = arith.constant 0 : index
    %7 = vector.load %arg4[%c0_5, %c0_6] : memref<16x512xbf16, #tpu.memory_space<vmem>>, vector<16x512xbf16>
    tpu.vector_store %arg4[%c0_5, %c0_6], %6 {strides = array<i32>} : memref<16x512xbf16, #tpu.memory_space<vmem>>, vector<16x512xbf16>,
    %8 = arith.extf %6 : vector<16x512xbf16> to vector<16x512xf32>
    %cst_7 = arith.constant dense<0.000000e+00> : vector<16xf32>
    %9 = vector.multi_reduction <add>, %8, %cst_7 [1] : vector<16x512xf32> to vector<16xf32>
    %10 = vector.shape_cast %9 : vector<16xf32> to vector<16x1xf32>
    %11 = vector.shape_cast %10 : vector<16x1xf32> to vector<1x16x1xf32>
    %c0_8 = arith.constant 0 : index
    %c0_9 = arith.constant 0 : index
    %c0_10 = arith.constant 0 : index
    %12 = vector.load %arg5[%c0_8, %c0_9, %c0_10] : memref<1x16x1xf32, #tpu.memory_space<vmem>>, vector<1x16x1xf32>
    tpu.vector_store %arg5[%c0_8, %c0_9, %c0_10], %11 {strides = array<i32>} : memref<1x16x1xf32, #tpu.memory_space<vmem>>, vector<1x16x1xf32>,
    %13 = arith.mulf %8, %8 : vector<16x512xf32>
    %cst_11 = arith.constant dense<0.000000e+00> : vector<16xf32>
    %14 = vector.multi_reduction <add>, %13, %cst_11 [1] : vector<16x512xf32> to vector<16xf32>
    %15 = vector.shape_cast %14 : vector<16xf32> to vector<16x1xf32>
    %16 = vector.shape_cast %15 : vector<16x1xf32> to vector<1x16x1xf32>
    %c0_12 = arith.constant 0 : index
    %c0_13 = arith.constant 0 : index
    %c0_14 = arith.constant 0 : index
    %17 = vector.load %arg6[%c0_12, %c0_13, %c0_14] : memref<1x16x1xf32, #tpu.memory_space<vmem>>, vector<1x16x1xf32>
    tpu.vector_store %arg6[%c0_12, %c0_13, %c0_14], %16 {strides = array<i32>} : memref<1x16x1xf32, #tpu.memory_space<vmem>>, vector<1x16x1xf32>,
    return
  }
  func.func @transform_0(%arg0: i32) -> (i32, i32) {
    %c0_i32 = arith.constant 0 : i32
    %c0_i32_0 = arith.constant 0 : i32
    return %c0_i32, %arg0 : i32, i32
  }
  func.func @transform_1(%arg0: i32) -> (i32, i32) {
    %c0_i32 = arith.constant 0 : i32
    %c0_i32_0 = arith.constant 0 : i32
    %c0_i32_1 = arith.constant 0 : i32
    return %c0_i32, %c0_i32_0 : i32, i32
  }
  func.func @transform_2(%arg0: i32) -> (i32, i32) {
    %c0_i32 = arith.constant 0 : i32
    %c0_i32_0 = arith.constant 0 : i32
    %c0_i32_1 = arith.constant 0 : i32
    return %c0_i32, %c0_i32_0 : i32, i32
  }
  func.func @transform_3(%arg0: i32) -> (i32, i32) {
    %c0_i32 = arith.constant 0 : i32
    %c0_i32_0 = arith.constant 0 : i32
    return %c0_i32, %arg0 : i32, i32
  }
  func.func @transform_4(%arg0: i32) -> (i32, i32, i32) {
    %c0_i32 = arith.constant 0 : i32
    %c0_i32_0 = arith.constant 0 : i32
    %c0_i32_1 = arith.constant 0 : i32
    return %arg0, %c0_i32, %c0_i32_0 : i32, i32, i32
  }
  func.func @transform_5(%arg0: i32) -> (i32, i32, i32) {
    %c0_i32 = arith.constant 0 : i32
    %c0_i32_0 = arith.constant 0 : i32
    %c0_i32_1 = arith.constant 0 : i32
    return %arg0, %c0_i32, %c0_i32_0 : i32, i32, i32
  }
}

module attributes {stable_mosaic.version = 11 : i64} {
  func.func @readout_kernel(%arg0: i32, %arg1: i32, %arg2: memref<1x16x1xf32, #tpu.memory_space<vmem>>, %arg3: memref<1x16x1xf32, #tpu.memory_space<vmem>>, %arg4: memref<16x256xbf16, #tpu.memory_space<vmem>>, %arg5: memref<256x4xf32, #tpu.memory_space<vmem>>, %arg6: memref<16x4xf32, #tpu.memory_space<vmem>>, %arg7: memref<1x1x4xf32, #tpu.memory_space<vmem>>, %arg8: memref<16x4xf32, #tpu.memory_space<vmem>>, %arg9: memref<16x1xf32, #tpu.memory_space<vmem>>, %arg10: memref<16x1xf32, #tpu.memory_space<vmem>>) attributes {dimension_semantics = [#tpu.dimension_semantics<parallel>, #tpu.dimension_semantics<arbitrary>], iteration_bounds = array<i64: 2, 1>, scalar_prefetch = 0 : i64, scratch_operands = 3 : i64, tpu.core_type = #tpu.core_type<tc>, window_params = [{pipeline_mode = #tpu.pipeline_mode<synchronous>, transform_indices = @transform_0, window_bounds = array<i64: 1, 16, 1>}, {pipeline_mode = #tpu.pipeline_mode<synchronous>, transform_indices = @transform_1, window_bounds = array<i64: 1, 16, 1>}, {transform_indices = @transform_2, window_bounds = array<i64: 16, 256>}, {transform_indices = @transform_3, window_bounds = array<i64: 256, 4>}, {pipeline_mode = #tpu.pipeline_mode<synchronous>, transform_indices = @transform_4, window_bounds = array<i64: 16, 4>}, {transform_indices = @transform_5, window_bounds = array<i64: 1, 1, 4>}]} {
    %c0_i32 = arith.constant 0 : i32
    %0 = arith.cmpi eq, %arg1, %c0_i32 : i32
    %1 = arith.extui %0 : i1 to i32
    %c0_i32_0 = arith.constant 0 : i32
    %2 = arith.cmpi ne, %1, %c0_i32_0 : i32
    scf.if %2 {
      %c0_15 = arith.constant 0 : index
      %c0_16 = arith.constant 0 : index
      %c0_17 = arith.constant 0 : index
      %24 = vector.load %arg2[%c0_15, %c0_16, %c0_17] : memref<1x16x1xf32, #tpu.memory_space<vmem>>, vector<1x16x1xf32>
      %cst_18 = arith.constant dense<0.000000e+00> : vector<16x1xf32>
      %25 = vector.multi_reduction <add>, %24, %cst_18 [0] : vector<1x16x1xf32> to vector<16x1xf32>
      %c0_19 = arith.constant 0 : index
      %c0_20 = arith.constant 0 : index
      %c0_21 = arith.constant 0 : index
      %26 = vector.load %arg3[%c0_19, %c0_20, %c0_21] : memref<1x16x1xf32, #tpu.memory_space<vmem>>, vector<1x16x1xf32>
      %cst_22 = arith.constant dense<0.000000e+00> : vector<16x1xf32>
      %27 = vector.multi_reduction <add>, %26, %cst_22 [0] : vector<1x16x1xf32> to vector<16x1xf32>
      %cst_23 = arith.constant 0.001953125 : f32
      %28 = vector.broadcast %cst_23 : f32 to vector<16x1xf32>
      %29 = arith.mulf %25, %28 : vector<16x1xf32>
      %cst_24 = arith.constant 0.001953125 : f32
      %30 = vector.broadcast %cst_24 : f32 to vector<16x1xf32>
      %31 = arith.mulf %27, %30 : vector<16x1xf32>
      %32 = arith.mulf %29, %29 : vector<16x1xf32>
      %33 = arith.subf %31, %32 : vector<16x1xf32>
      %cst_25 = arith.constant 0.000000e+00 : f32
      %34 = vector.broadcast %cst_25 : f32 to vector<16x1xf32>
      %35 = arith.maximumf %33, %34 : vector<16x1xf32>
      %cst_26 = arith.constant 9.99999974E-5 : f32
      %36 = vector.broadcast %cst_26 : f32 to vector<16x1xf32>
      %37 = arith.addf %35, %36 : vector<16x1xf32>
      %38 = math.rsqrt %37 : vector<16x1xf32>
      %c0_27 = arith.constant 0 : index
      %c0_28 = arith.constant 0 : index
      %39 = vector.load %arg9[%c0_27, %c0_28] : memref<16x1xf32, #tpu.memory_space<vmem>>, vector<16x1xf32>
      tpu.vector_store %arg9[%c0_27, %c0_28], %38 {strides = array<i32>} : memref<16x1xf32, #tpu.memory_space<vmem>>, vector<16x1xf32>,
      %40 = arith.mulf %29, %38 : vector<16x1xf32>
      %c0_29 = arith.constant 0 : index
      %c0_30 = arith.constant 0 : index
      %41 = vector.load %arg10[%c0_29, %c0_30] : memref<16x1xf32, #tpu.memory_space<vmem>>, vector<16x1xf32>
      tpu.vector_store %arg10[%c0_29, %c0_30], %40 {strides = array<i32>} : memref<16x1xf32, #tpu.memory_space<vmem>>, vector<16x1xf32>,
      %cst_31 = arith.constant 0.000000e+00 : f32
      %42 = vector.broadcast %cst_31 : f32 to vector<16x4xf32>
      %c0_32 = arith.constant 0 : index
      %c0_33 = arith.constant 0 : index
      %43 = vector.load %arg8[%c0_32, %c0_33] : memref<16x4xf32, #tpu.memory_space<vmem>>, vector<16x4xf32>
      tpu.vector_store %arg8[%c0_32, %c0_33], %42 {strides = array<i32>} : memref<16x4xf32, #tpu.memory_space<vmem>>, vector<16x4xf32>,
    } else {
    }
    %c0 = arith.constant 0 : index
    %c0_1 = arith.constant 0 : index
    %3 = vector.load %arg4[%c0, %c0_1] : memref<16x256xbf16, #tpu.memory_space<vmem>>, vector<16x256xbf16>
    %4 = arith.extf %3 : vector<16x256xbf16> to vector<16x256xf32>
    %c0_2 = arith.constant 0 : index
    %c0_3 = arith.constant 0 : index
    %5 = vector.load %arg9[%c0_2, %c0_3] : memref<16x1xf32, #tpu.memory_space<vmem>>, vector<16x1xf32>
    %6 = vector.broadcast %5 : vector<16x1xf32> to vector<16x256xf32>
    %7 = arith.mulf %4, %6 : vector<16x256xf32>
    %c0_4 = arith.constant 0 : index
    %c0_5 = arith.constant 0 : index
    %8 = vector.load %arg10[%c0_4, %c0_5] : memref<16x1xf32, #tpu.memory_space<vmem>>, vector<16x1xf32>
    %9 = vector.broadcast %8 : vector<16x1xf32> to vector<16x256xf32>
    %10 = arith.subf %7, %9 : vector<16x256xf32>
    %cst = arith.constant 0.000000e+00 : f32
    %11 = vector.broadcast %cst : f32 to vector<16x256xf32>
    %12 = arith.maximumf %10, %11 : vector<16x256xf32>
    %13 = arith.truncf %12 : vector<16x256xf32> to vector<16x256xbf16>
    %c0_6 = arith.constant 0 : index
    %c0_7 = arith.constant 0 : index
    %14 = vector.load %arg5[%c0_6, %c0_7] : memref<256x4xf32, #tpu.memory_space<vmem>>, vector<256x4xf32>
    %15 = math.absf %14 : vector<256x4xf32>
    %16 = arith.truncf %15 : vector<256x4xf32> to vector<256x4xbf16>
    %c0_8 = arith.constant 0 : index
    %c0_9 = arith.constant 0 : index
    %17 = vector.load %arg8[%c0_8, %c0_9] : memref<16x4xf32, #tpu.memory_space<vmem>>, vector<16x4xf32>
    %cst_10 = arith.constant dense<0.000000e+00> : vector<16x4xf32>
    %18 = tpu.matmul %13, %16, %cst_10 {dimension_numbers = #tpu.dot_dimension_numbers<[1], [0], [0], [1], [0, 0, 1, 1], [], []>} : vector<16x256xbf16>, vector<256x4xbf16>, vector<16x4xf32> -> vector<16x4xf32>
    %19 = arith.addf %17, %18 : vector<16x4xf32>
    %c0_11 = arith.constant 0 : index
    %c0_12 = arith.constant 0 : index
    %20 = vector.load %arg8[%c0_11, %c0_12] : memref<16x4xf32, #tpu.memory_space<vmem>>, vector<16x4xf32>
    tpu.vector_store %arg8[%c0_11, %c0_12], %19 {strides = array<i32>} : memref<16x4xf32, #tpu.memory_space<vmem>>, vector<16x4xf32>,
    %c0_i32_13 = arith.constant 0 : i32
    %21 = arith.cmpi eq, %arg1, %c0_i32_13 : i32
    %22 = arith.extui %21 : i1 to i32
    %c0_i32_14 = arith.constant 0 : i32
    %23 = arith.cmpi ne, %22, %c0_i32_14 : i32
    scf.if %23 {
      %c0_15 = arith.constant 0 : index
      %c0_16 = arith.constant 0 : index
      %24 = vector.load %arg8[%c0_15, %c0_16] : memref<16x4xf32, #tpu.memory_space<vmem>>, vector<16x4xf32>
      %c0_17 = arith.constant 0 : index
      %c0_18 = arith.constant 0 : index
      %25 = vector.load %arg6[%c0_17, %c0_18] : memref<16x4xf32, #tpu.memory_space<vmem>>, vector<16x4xf32>
      %26 = arith.mulf %24, %25 : vector<16x4xf32>
      %cst_19 = arith.constant dense<0.000000e+00> : vector<4xf32>
      %27 = vector.multi_reduction <add>, %26, %cst_19 [0] : vector<16x4xf32> to vector<4xf32>
      %28 = vector.shape_cast %27 : vector<4xf32> to vector<1x1x4xf32>
      %c0_20 = arith.constant 0 : index
      %c0_21 = arith.constant 0 : index
      %c0_22 = arith.constant 0 : index
      %29 = vector.load %arg7[%c0_20, %c0_21, %c0_22] : memref<1x1x4xf32, #tpu.memory_space<vmem>>, vector<1x1x4xf32>
      tpu.vector_store %arg7[%c0_20, %c0_21, %c0_22], %28 {strides = array<i32>} : memref<1x1x4xf32, #tpu.memory_space<vmem>>, vector<1x1x4xf32>,
    } else {
    }
    return
  }
  func.func @transform_0(%arg0: i32, %arg1: i32) -> (i32, i32, i32) {
    %c0_i32 = arith.constant 0 : i32
    %c0_i32_0 = arith.constant 0 : i32
    %c0_i32_1 = arith.constant 0 : i32
    %c0_i32_2 = arith.constant 0 : i32
    return %c0_i32, %c0_i32_0, %c0_i32_1 : i32, i32, i32
  }
  func.func @transform_1(%arg0: i32, %arg1: i32) -> (i32, i32, i32) {
    %c0_i32 = arith.constant 0 : i32
    %c0_i32_0 = arith.constant 0 : i32
    %c0_i32_1 = arith.constant 0 : i32
    %c0_i32_2 = arith.constant 0 : i32
    return %c0_i32, %c0_i32_0, %c0_i32_1 : i32, i32, i32
  }
  func.func @transform_2(%arg0: i32, %arg1: i32) -> (i32, i32) {
    %c1_i32 = arith.constant 1 : i32
    %0 = arith.muli %arg0, %c1_i32 : i32
    %1 = arith.addi %0, %arg1 : i32
    %c0_i32 = arith.constant 0 : i32
    %c0_i32_0 = arith.constant 0 : i32
    return %c0_i32, %1 : i32, i32
  }
  func.func @transform_3(%arg0: i32, %arg1: i32) -> (i32, i32) {
    %c0_i32 = arith.constant 0 : i32
    %c0_i32_0 = arith.constant 0 : i32
    return %arg1, %c0_i32 : i32, i32
  }
  func.func @transform_4(%arg0: i32, %arg1: i32) -> (i32, i32) {
    %c0_i32 = arith.constant 0 : i32
    %c0_i32_0 = arith.constant 0 : i32
    %c0_i32_1 = arith.constant 0 : i32
    return %c0_i32, %c0_i32_0 : i32, i32
  }
  func.func @transform_5(%arg0: i32, %arg1: i32) -> (i32, i32, i32) {
    %c0_i32 = arith.constant 0 : i32
    %c0_i32_0 = arith.constant 0 : i32
    %c0_i32_1 = arith.constant 0 : i32
    return %arg0, %c0_i32, %c0_i32_0 : i32, i32, i32
  }
}

</mosaic_0001>

<bundles_post_ra>
// kernel: model_forward.2
= control target key start
LH: loop header
LB: loop body
LE: loop exit
PB: predicated region body
PF: predicated region fallthrough
CT: control target
= control target key end

     0   :  { %v257_v3 = vmov 0   ;;  %vm85_vm0 = vcmask 261120   ;;  %vm171_vm1 = vcmask 7168   ;;  %s369_s0 = inlined_call_operand.vmem [shape: bf16[32,512], index: 0, kind: input, shape index: {}]   ;;  %s370_s2 = inlined_call_operand.vmem [shape: f32[16,1], index: 2, kind: input, shape index: {}]   ;;  %s371_s1 = inlined_call_operand.vmem [shape: bf16[16,32], index: 1, kind: input, shape index: {}]   ;;  %s372_s3 = inlined_call_operand.vmem [shape: bf16[16,512], index: 3, kind: output, shape index: {0}]   ;;  %s373_s4 = inlined_call_operand.vmem [shape: f32[1,16,1], index: 4, kind: output, shape index: {1}]   ;;  %s374_s5 = inlined_call_operand.vmem [shape: f32[1,16,1], index: 5, kind: output, shape index: {2}]  }
   0x1   :  { %v228_v0 = vld [vmem:[%s369_s0 + $0x20] sm:$0xf]  ;;  %v253_v1 = vld [vmem:[%s369_s0 + $0x2c] sm:$0xf0]  ;;  %v251_v2 = vld [vmem:[%s369_s0 + $0x24] sm:$0xf]  ;;  %256 = vset.pattern.permute.xlu0 %v257_v3 }
   0x2   :  { %v229_v4 = vor.u32 %v253_v1, %v228_v0  ;;  %v230_v5 = vld [vmem:[%s369_s0 + $0x30] sm:$0xf0]  ;;  %v236_v6 = vld [vmem:[%s369_s0 + $0x28] sm:$0xf]  ;;  %v254_v7 = vld [vmem:[%s369_s0 + $0x34] sm:$0xf0] }
   0x3   :  { %v233_v8 = vor.u32 %v251_v2, %v230_v5  ;;  %v237_v9 = vor.u32 %v254_v7, %v236_v6  ;;  %v252_v10 = vld [vmem:[%s369_s0 + $0x2c] sm:$0xf]  ;;  %v238_v11 = vld [vmem:[%s369_s0 + $0x38] sm:$0xf0]  ;;  %v212_v12 = vld [vmem:[%s369_s0] sm:$0xf] }
   0x4   :  { %95 = vmatpush.bf16.msra.mxu0 %v229_v4  ;;  %v241_v13 = vor.u32 %v252_v10, %v238_v11  ;;  %v249_v14 = vld [vmem:[%s369_s0 + $0xc] sm:$0xf0]  ;;  %v247_v15 = vld [vmem:[%s369_s0 + $0x4] sm:$0xf]  ;;  %v214_v16 = vld [vmem:[%s369_s0 + $0x10] sm:$0xf0] }
   0x5   :  { %109 = vmatpush.bf16.msra.mxu1 %v233_v8  ;;  %123 = vmatpush.bf16.msra.mxu2 %v237_v9  ;;  %v213_v17 = vor.u32 %v249_v14, %v212_v12  ;;  %v217_v18 = vor.u32 %v247_v15, %v214_v16  ;;  %v220_v19 = vld [vmem:[%s369_s0 + $0x8] sm:$0xf]  ;;  %v250_v20 = vld [vmem:[%s369_s0 + $0x14] sm:$0xf0]  ;;  %v248_v21 = vld [vmem:[%s369_s0 + $0xc] sm:$0xf] }
   0x6   :  { %137 = vmatpush.bf16.msra.mxu3 %v241_v13  ;;  %v221_v22 = vor.u32 %v250_v20, %v220_v19  ;;  %v222_v23 = vld [vmem:[%s369_s0 + $0x18] sm:$0xf0]  ;;  %v28_v24 = vld [vmem:[%s370_s2] sm:$0xff]  ;;  %v29_v27 = vld [vmem:[%s370_s2 + $0x8] sm:$0xff] }
   0x7   :  { %v225_v25 = vor.u32 %v248_v21, %v222_v23  ;;  %v246_v26 = vld [vmem:[%s371_s1] sm:$0xff]  ;;  %32 = vperm.xlu0 %256, %v28_v24  }
   0x8   :  { %96 = vmatpush.bf16.msra.mxu0 %v213_v17 }
   0x9   :  { %110 = vmatpush.bf16.msra.mxu1 %v217_v18  ;;  %124 = vmatpush.bf16.msra.mxu2 %v221_v22 }
   0xa   :  { %138 = vmatpush.bf16.msra.mxu3 %v225_v25 }
   0xb   :  { %242 = vmatmul.msk.bf16.vlgmr.msra.gmra.mxu0 %vm85_vm0, %v246_v26 }
   0xc   :  { %243 = vmatmul.msk.bf16.vlgmr.msra.gmra.mxu1 %vm85_vm0, %v246_v26  ;;  %244 = vmatmul.msk.bf16.vlgmr.msra.gmra.mxu2 %vm85_vm0, %v246_v26 }
   0xd   :  { %245 = vmatmul.msk.bf16.vlgmr.msra.gmra.mxu3 %vm85_vm0, %v246_v26 }
   0xf   :  { %37 = vperm.xlu0 %256, %v29_v27  }
  0x79   :  { %v33_v28 = vpop.permute.xlu0 %32 }
  0x81   :  { %v38_v36 = vpop.permute.xlu0 %37 }
  0x88   :  { %v98_v29 = vpop.f32.mrf.mxu0 }
  0x89   :  { %v99_v30 = vadd.f32 %v98_v29, %v33_v28  ;;  %v112_v31 = vpop.f32.mrf.mxu1 }
  0x8a   :  { %v113_v32 = vadd.f32 %v112_v31, %v33_v28 }
  0x8c   :  { %v145_v33 = vpack.c.bf16 %v113_v32, %v99_v30 }
  0x8e   :  { %149 = vst [vmem:[%s372_s3] sm:$0xff] %v145_v33  ;;  %v153_v34 = vunpack.c.l.bf16 %v145_v33  ;;  %v154_v35 = vunpack.c.h.bf16 %v145_v33 }
  0x8f   :  { %v126_v37 = vpop.f32.mrf.mxu2 }
  0x90   :  { %v127_v38 = vadd.f32 %v126_v37, %v33_v28  ;;  %v140_v39 = vpop.f32.mrf.mxu3  ;;  %v100_v40 = vpop.f32.mrf.mxu0  ;;  %v174_v44 = vmul.f32 %v153_v34, %v153_v34  ;;  %v175_v45 = vmul.f32 %v154_v35, %v154_v35  ;;  %v161_v48 = vadd.f32 %v154_v35, %v153_v34 }
  0x91   :  { %v141_v41 = vadd.f32 %v140_v39, %v33_v28  ;;  %v101_v42 = vadd.f32 %v100_v40, %v38_v36  ;;  %v114_v43 = vpop.f32.mrf.mxu1 }
  0x92   :  { %v115_v46 = vadd.f32 %v114_v43, %v38_v36  ;;  %v182_v52 = vadd.f32 %v175_v45, %v174_v44 }
  0x93   :  { %v146_v47 = vpack.c.bf16 %v141_v41, %v127_v38 }
  0x94   :  { %v147_v49 = vpack.c.bf16 %v115_v46, %v101_v42 }
  0x95   :  { %150 = vst [vmem:[%s372_s3 + $0x8] sm:$0xff] %v146_v47  ;;  %v155_v50 = vunpack.c.l.bf16 %v146_v47  ;;  %v156_v51 = vunpack.c.h.bf16 %v146_v47 }
  0x96   :  { %151 = vst [vmem:[%s372_s3 + $0x10] sm:$0xff] %v147_v49  ;;  %v157_v53 = vunpack.c.l.bf16 %v147_v49  ;;  %v158_v54 = vunpack.c.h.bf16 %v147_v49 }
  0x97   :  { %v128_v55 = vpop.f32.mrf.mxu2  ;;  %v162_v56 = vadd.f32 %v161_v48, %v155_v50  ;;  %v176_v57 = vmul.f32 %v155_v50, %v155_v50  ;;  %v177_v62 = vmul.f32 %v156_v51, %v156_v51 }
  0x98   :  { %v129_v58 = vadd.f32 %v128_v55, %v38_v36  ;;  %v142_v59 = vpop.f32.mrf.mxu3  ;;  %v178_v2 = vmul.f32 %v157_v53, %v157_v53  ;;  %v179_v3 = vmul.f32 %v158_v54, %v158_v54  ;;  %v166_v6 = vadd.f32 %v158_v54, %v157_v53 }
  0x99   :  { %v143_v60 = vadd.f32 %v142_v59, %v38_v36  ;;  %v163_v61 = vadd.f32 %v162_v56, %v156_v51  ;;  %v183_v63 = vadd.f32 %v182_v52, %v176_v57 }
  0x9a   :  { %v187_v9 = vadd.f32 %v179_v3, %v178_v2 }
  0x9b   :  { %v148_v0 = vpack.c.bf16 %v143_v60, %v129_v58  ;;  %164 = vadd.xlane.f32.xlu1 %v163_v61  ;;  %v184_v1 = vadd.f32 %v183_v63, %v177_v62 }
  0x9d   :  { %152 = vst [vmem:[%s372_s3 + $0x18] sm:$0xff] %v148_v0  ;;  %185 = vadd.xlane.f32.xlu2 %v184_v1  ;;  %v159_v4 = vunpack.c.l.bf16 %v148_v0  ;;  %v160_v5 = vunpack.c.h.bf16 %v148_v0 }
  0x9f   :  { %v167_v7 = vadd.f32 %v166_v6, %v159_v4  ;;  %v180_v8 = vmul.f32 %v159_v4, %v159_v4  ;;  %v181_v11 = vmul.f32 %v160_v5, %v160_v5 }
  0xa1   :  { %v168_v10 = vadd.f32 %v167_v7, %v160_v5  ;;  %v188_v12 = vadd.f32 %v187_v9, %v180_v8 }
  0xa3   :  { %169 = vadd.xlane.f32.xlu1 %v168_v10  ;;  %v189_v13 = vadd.f32 %v188_v12, %v181_v11 }
  0xa5   :  { %190 = vadd.xlane.f32.xlu2 %v189_v13 }
 0x10e   :  { %v165_v14 = vpop.xlane.xlu1 %164 }
 0x10f   :  { %172 = vst.msk [vmem:[%s373_s4] sm:$0xff] %vm171_vm1, %v165_v14 }
 0x110   :  { %v186_v15 = vpop.xlane.xlu2 %185 }
 0x111   :  { %192 = vst.msk [vmem:[%s374_s5] sm:$0xff] %vm171_vm1, %v186_v15 }
 0x116   :  { %v170_v16 = vpop.xlane.xlu1 %169 }
 0x117   :  { %173 = vst.msk [vmem:[%s373_s4 + $0x8] sm:$0xff] %vm171_vm1, %v170_v16 }
 0x118   :  { %v191_v17 = vpop.xlane.xlu2 %190 }
 0x119   :  { %193 = vst.msk [vmem:[%s374_s5 + $0x8] sm:$0xff] %vm171_vm1, %v191_v17 }

// kernel: model_forward.3
= control target key start
LH: loop header
LB: loop body
LE: loop exit
PB: predicated region body
PF: predicated region fallthrough
CT: control target
= control target key end

     0   :  { %10 = vsyncpa [#allocation7], 0  ;;  %s1060_s0 = inlined_call_operand.vmem [shape: f32[1,16,1], index: 0, kind: input, shape index: {}]   ;;  %s1061_s1 = inlined_call_operand.vmem [shape: f32[1,16,1], index: 1, kind: input, shape index: {}]   ;;  %s1062_s2 = inlined_call_operand.vmem [shape: bf16[16,512], index: 2, kind: input, shape index: {}]   ;;  %s1063_s3 = inlined_call_operand.vmem [shape: f32[256,4], index: 3, kind: input, shape index: {}]   ;;  %s1064_s4 = inlined_call_operand.vmem [shape: f32[16,4], index: 4, kind: input, shape index: {}]   ;;  %s1065_s5 = inlined_call_operand.hbm [shape: f32[2,1,4], index: 5, kind: output, shape index: {}]  }
   0x1   :  { %12 = vsyncpa [#allocation7 + $0x1], 0  ;;  %s820_s18 = smov 0   ;;  %s822_s19 = smov 0  }
   0x2   :  { %s824_s20 = smov 0   ;;  %s826_s21 = smov 0  }
   0x3   :  { %s828_s22 = smov 0   ;;  %s830_s23 = smov 0  }
   0x4 LB: > { %s632_s24 = sadd.s32 4294967295, %s786_s23   ;;  %s633_s25 = sadd.s32 4294967294, %s786_s23   ;;  %s786_s23 = sphi %s830_s23, %s18_s23   ;;  %s782_s22 = sphi %s828_s22, %s1072_s22   ;;  %s778_s21 = sphi %s826_s21, %s1071_s21   ;;  %s774_s20 = sphi %s824_s20, %s1070_s20   ;;  %s770_s19 = sphi %s822_s19, %s1069_s19   ;;  %s766_s18 = sphi %s820_s18, %s1068_s18  }
   0x5   : > { %s30_s26 = sadd.s32 1, %s782_s22  ;;  %s81_s27 = sadd.s32 1, %s774_s20 }
   0x6   : > { %p32_p0 = scmp.ge.s32.totalorder %s30_s26, 2  ;;  %p88_p1 = scmp.ne.s32.totalorder %s774_s20, %s770_s19 }
   0x7   : > { %p89_p2 = scmp.eq.s32.totalorder %s786_s23, 0  ;;  %p165_p3 = scmp.eq.s32.totalorder %s632_s24, 1 }
   0x8   : > { %s1074_s26 = smov (%p32_p0, %s30_s26), 0  ;;  %p170_p6 = scmp.ne.s32.totalorder %s770_s19, %s766_s18 }
   0x9   : > { %p90_p4 = por %p89_p2, %p88_p1  ;;  %p859_p5 = por %p165_p3, %p88_p1 }
   0xa   : > { %s78_s29 = ssub.s32 %s782_s22, %s1074_s26  ;;  %p171_p8 = scmp.eq.s32.totalorder %s633_s25, 1 }
   0xb   : > { %p79_p7 = scmp.eq.s32.totalorder %s78_s29, 0  ;;  %p636_p10 = scmp.ge.s32.totalorder %s786_s23, 2 }
   0xc   : > { %p870_p9 = por %p171_p8, %p170_p6 }
   0xd   : > { %s868_s30 = scalar_select %p79_p7, %s774_s20, %s81_s27  }
   0xe   : > { %205 = sbr.rel (%p636_p10) target bundleno = 25 (0x19), region = 32 }
  0x13   : > { %208 = sbr.rel (!%p90_p4) target bundleno = 25 (0x19), region = 36  ;;  %s210_s7 = sand.u32 (%p90_p4), 1, %s774_s20  }
  0x14   : > { %s644_s8 = sshll.u32 (%p90_p4), %s782_s22, 3  ;;  %s637_s9 = sshll.u32 (%p90_p4), %s210_s7, 4 }
  0x15   : > { %s216_s12 = scalar_lea.vmem (%p90_p4), %s1062_s2, %s644_s8  ;;  %s212_s13 = scalar_lea.vmem (%p90_p4), [#allocation5], %s637_s9 }
  0x16   : > { %v247_v0 = vld [vmem:[%s216_s12] sm:$0xff] (%p90_p4)  ;;  %v249_v1 = vld [vmem:[%s216_s12 + $0x10] sm:$0xff] (%p90_p4) }
  0x17   : > { %248 = vst [vmem:[%s212_s13] sm:$0xff] (%p90_p4), %v247_v0 }
  0x18   : > { %250 = vst [vmem:[%s212_s13 + $0x8] sm:$0xff] %v249_v1 }
  0x19 PF: > { %p640_p11 = scmp.ge.s32.totalorder %s786_s23, 1  ;;  %p255_p12 = scmp.lt.s32.totalorder %s786_s23, 3 }
  0x1b   : > { %p256_p13 = pnand %p640_p11, %p255_p12 }
  0x1c   : > { %s1006_s11 = sand.u32 (!%p256_p13), 1, %s770_s19   ;;  %s543_s27 = scalar_lea.hbm (!%p256_p13), %s1065_s5, %s778_s21 }
  0x1d   : > { %259 = sbr.rel (%p256_p13) target bundleno = 368 (0x170), region = 74  ;;  %s641_s12 = sshll.u32 (!%p256_p13), %s1006_s11, 4 }
  0x1e   : > { %s264_s13 = scalar_lea.vmem (!%p256_p13), [#allocation5], %s641_s12  ;;  %s292_s29 = scalar_lea.vmem (!%p256_p13), [#allocation6], %s1006_s11 }
  0x1f   : > { %s545_s7 = sshll.u32 (!%p256_p13), %s292_s29, 4  ;;  %s547_s8 = sshll.u32 (!%p256_p13), %s543_s27, 4  ;;  %s546_s7 = int_to_ptr.vmem [resolvable:$true] %s545_s7  ;;  %s548_s8 = int_to_ptr.hbm [resolvable:$true] %s547_s8 }
  0x20   : > { %s535_s9 = scalar_lea.sflag (!%p256_p13), [#allocation7], %s1006_s11  ;;  %s722_s10 = sshra.s32 (!%p256_p13), %s548_s8, 4  ;;  %s723_s10 = int_to_ptr.hbm [resolvable:$true] %s722_s10 }
  0x21   : > { %s724_s12 = scalar_lea.hbm (!%p256_p13), %s723_s10, 1  ;;  %s728_s14 = scalar_lea.hbm (!%p256_p13), %s1065_s5, 2 }
  0x22   : > { %v305_v2 = vld [vmem:[%s1060_s0] sm:$0xff]  ;;  %v306_v4 = vld [vmem:[%s1060_s0 + $0x8] sm:$0xff]  ;;  %v788_v5 = vmov 0   ;;  %v413_v19 = vld [vmem:[%s1063_s3 + $0x70] sm:$0xff]  ;;  %vm345_vm5 = vcmask 7168   ;;  %vm352_vm7 = vcmask 31744   ;;  %p725_p0 = scmp.ne.s32.totalorder %s723_s10, %s724_s12  ;;  %p729_p3 = scmp.lt.s32.totalorder %s723_s10, %s1065_s5 }
  0x23   : > { %v309_v3 = vld [vmem:[%s1061_s1] sm:$0xff]  ;;  %702 = vset.pattern.permute.xlu0 %v788_v5  ;;  %v893_v6 = vmul.f32 0.001953125, %v305_v2  ;;  %703 = vset.pattern.permute.xlu1 %v788_v5  ;;  %v310_v8 = vld [vmem:[%s1061_s1 + $0x8] sm:$0xff]  ;;  %v898_v9 = vmul.f32 0.001953125, %v306_v4  ;;  %v414_v20 = vld [vmem:[%s1063_s3 + $0x78] sm:$0xff]  ;;  %vm532_vm8 = vcmask 24576   ;;  %p730_p4 = scmp.lt.s32.totalorder %s728_s14, %s724_s12 }
  0x24   : > { %v315_v7 = vmul.f32 0.001953125, %v309_v3  ;;  %v316_v10 = vmul.f32 0.001953125, %v310_v8  ;;  %v429_v21 = vld [vmem:[%s1063_s3 + $0xf0] sm:$0xff]  ;;  %v445_v22 = vand.u32 2147483647, %v413_v19  ;;  %v430_v24 = vld [vmem:[%s1063_s3 + $0xf8] sm:$0xff]  ;;  %p726_p1 = pnand %p725_p0, %p859_p5 }
  0x25   : > { %v317_v11 = vmul.f32 %v893_v6, %v893_v6  ;;  %v318_v12 = vmul.f32 %v898_v9, %v898_v9  ;;  %v446_v23 = vand.u32 2147483647, %v414_v20  ;;  %v411_v25 = vld [vmem:[%s1063_s3 + $0x60] sm:$0xff]  ;;  %v461_v27 = vand.u32 2147483647, %v429_v21  ;;  %v412_v29 = vld [vmem:[%s1063_s3 + $0x68] sm:$0xff]  ;;  %p731_p6 = por %p730_p4, %p729_p3 }
  0x26   : > { %v462_v28 = vand.u32 2147483647, %v430_v24  ;;  %v427_v30 = vld [vmem:[%s1063_s3 + $0xe0] sm:$0xff]  ;;  %v443_v34 = vand.u32 2147483647, %v411_v25  ;;  %v428_v35 = vld [vmem:[%s1063_s3 + $0xe8] sm:$0xff]  ;;  %p727_p2 = pneg %p726_p1 }
  0x27   : > { %v319_v13 = vsub.f32 %v315_v7, %v317_v11  ;;  %v320_v14 = vsub.f32 %v316_v10, %v318_v12  ;;  %v470_v33 = vpack.c.bf16 %v446_v23, %v445_v22  ;;  %v409_v36 = vld [vmem:[%s1063_s3 + $0x50] sm:$0xff]  ;;  %v410_v37 = vld [vmem:[%s1063_s3 + $0x58] sm:$0xff]  ;;  %v444_v40 = vand.u32 2147483647, %v412_v29  ;;  %v407_v51 = vld [vmem:[%s1063_s3 + $0x40] sm:$0xff] }
  0x28   : > { %v478_v39 = vpack.c.bf16 %v462_v28, %v461_v27  ;;  %v425_v41 = vld [vmem:[%s1063_s3 + $0xd0] sm:$0xff]  ;;  %v426_v42 = vld [vmem:[%s1063_s3 + $0xd8] sm:$0xff]  ;;  %v459_v44 = vand.u32 2147483647, %v427_v30  ;;  %v460_v45 = vand.u32 2147483647, %v428_v35  ;;  %p732_p7 = pnand %p731_p6, %p727_p2 }
  0x29   : > { %v321_v15 = vmax.f32 %v319_v13, 0.0  ;;  %v322_v16 = vmax.f32 %v320_v14, 0.0  ;;  %481 = vmatpush.bf16.msra.mxu0 %v470_v33  ;;  %v441_v46 = vand.u32 2147483647, %v409_v36  ;;  %v469_v48 = vpack.c.bf16 %v444_v40, %v443_v34  ;;  %v408_v52 = vld [vmem:[%s1063_s3 + $0x48] sm:$0xff]  ;;  %v423_v56 = vld [vmem:[%s1063_s3 + $0xc0] sm:$0xff] }
  0x2a   : > { %495 = vmatpush.bf16.msra.mxu1 %v478_v39  ;;  %v442_v49 = vand.u32 2147483647, %v410_v37  ;;  %v457_v50 = vand.u32 2147483647, %v425_v41  ;;  %v477_v54 = vpack.c.bf16 %v460_v45, %v459_v44  ;;  %v458_v55 = vand.u32 2147483647, %v426_v42 }
  0x2b   : > { %v323_v17 = vadd.f32 0.0001, %v321_v15  ;;  %v324_v18 = vadd.f32 0.0001, %v322_v16  ;;  %v424_v58 = vld [vmem:[%s1063_s3 + $0xc8] sm:$0xff]  ;;  %v422_v20 = vld [vmem:[%s1063_s3 + $0xb8] sm:$0xff] }
  0x2c   : > { %v468_v60 = vpack.c.bf16 %v442_v49, %v441_v46  ;;  %v439_v61 = vand.u32 2147483647, %v407_v51  ;;  %v440_v62 = vand.u32 2147483647, %v408_v52  ;;  %v476_v0 = vpack.c.bf16 %v458_v55, %v457_v50  ;;  %v403_v25 = vld [vmem:[%s1063_s3 + $0x20] sm:$0xff]  ;;  %v420_v30 = vld [vmem:[%s1063_s3 + $0xa8] sm:$0xff] }
  0x2d   : > { %704 = vrsqrt.f32 %v323_v17  ;;  %vm331_vm0 = vweird.f32 %v323_v17  ;;  %vm341_vm2 = vweird.f32 %v324_v18  ;;  %482 = vmatpush.bf16.msra.mxu0 %v469_v48  ;;  %v455_v1 = vand.u32 2147483647, %v423_v56  ;;  %v419_v27 = vld [vmem:[%s1063_s3 + $0xa0] sm:$0xff]  ;;  %v401_v35 = vld [vmem:[%s1063_s3 + $0x10] sm:$0xff]  ;;  %v402_v36 = vld [vmem:[%s1063_s3 + $0x18] sm:$0xff] }
  0x2e   : > { %706 = vrsqrt.f32 %v324_v18  ;;  %496 = vmatpush.bf16.msra.mxu1 %v477_v54  ;;  %v456_v2 = vand.u32 2147483647, %v424_v58  ;;  %v467_v7 = vpack.c.bf16 %v440_v62, %v439_v61  ;;  %v454_v22 = vand.u32 2147483647, %v422_v20  ;;  %v417_v37 = vld [vmem:[%s1063_s3 + $0x90] sm:$0xff]  ;;  %v418_v40 = vld [vmem:[%s1063_s3 + $0x98] sm:$0xff] }
  0x2f   : > { %v435_v28 = vand.u32 2147483647, %v403_v25  ;;  %v434_v39 = vand.u32 2147483647, %v402_v36  ;;  %v449_v41 = vand.u32 2147483647, %v417_v37 }
  0x30   : > { %v475_v11 = vpack.c.bf16 %v456_v2, %v455_v1  ;;  %v450_v42 = vand.u32 2147483647, %v418_v40  ;;  %v399_v45 = vld [vmem:[%s1063_s3] sm:$0xff]  ;;  %v400_v46 = vld [vmem:[%s1063_s3 + $0x8] sm:$0xff] }
  0x31   : > { %483 = vmatpush.bf16.msra.mxu0 %v468_v60  ;;  %v431_v48 = vand.u32 2147483647, %v399_v45  ;;  %v432_v49 = vand.u32 2147483647, %v400_v46  ;;  %v416_v50 = vld [vmem:[%s1063_s3 + $0x88] sm:$0xff]  ;;  %v355_v55 = vld [vmem:[%s264_s13] sm:$0xff] }
  0x32   : > { %497 = vmatpush.bf16.msra.mxu1 %v476_v0  ;;  %v472_v44 = vpack.c.bf16 %v450_v42, %v449_v41  ;;  %v448_v52 = vand.u32 2147483647, %v416_v50  ;;  %v358_v58 = vunpack.c.h.bf16 %v355_v55  ;;  %v356_v60 = vld [vmem:[%s264_s13 + $0x8] sm:$0xff] }
  0x33   : > { %v705_v26 = vpop.eup %704  ;;  %v360_v0 = vunpack.c.h.bf16 %v356_v60 }
  0x34   : > { %v707_v31 = vpop.eup %706  ;;  %v326_v32 = vmul.f32 %v705_v26, %v323_v17  ;;  %vm332_vm1 = vweird.f32 %v705_v26  ;;  %v421_v17 = vld [vmem:[%s1063_s3 + $0xb0] sm:$0xff] }
  0x35   : > { %v336_v38 = vmul.f32 %v707_v31, %v324_v18  ;;  %vm342_vm3 = vweird.f32 %v707_v31  ;;  %vm333_vm4 = vmor %vm331_vm0, %vm332_vm1  ;;  %484 = vmatpush.bf16.msra.mxu0 %v467_v7  ;;  %v453_v21 = vand.u32 2147483647, %v421_v17 }
  0x36   : > { %v327_v43 = vmul.f32 %v705_v26, %v326_v32  ;;  %vm343_vm6 = vmor %vm341_vm2, %vm342_vm3  ;;  %498 = vmatpush.bf16.msra.mxu1 %v475_v11  ;;  %v452_v32 = vand.u32 2147483647, %v420_v30 }
  0x37   : > { %v337_v47 = vmul.f32 %v707_v31, %v336_v38  ;;  %v474_v24 = vpack.c.bf16 %v454_v22, %v453_v21  ;;  %v433_v38 = vand.u32 2147483647, %v401_v35 }
  0x38   : > { %v328_v53 = vmul.f32 0.5, %v327_v43 }
  0x39   : > { %v338_v57 = vmul.f32 0.5, %v337_v47  ;;  %v464_v43 = vpack.c.bf16 %v434_v39, %v433_v38  ;;  %v415_v47 = vld [vmem:[%s1063_s3 + $0x80] sm:$0xff] }
  0x3a   : > { %v329_v59 = vsub.f32 1.5, %v328_v53  ;;  %499 = vmatpush.bf16.msra.mxu1 %v474_v24  ;;  %v447_v51 = vand.u32 2147483647, %v415_v47  ;;  %v463_v53 = vpack.c.bf16 %v432_v49, %v431_v48 }
  0x3b   : > { %v339_v63 = vsub.f32 1.5, %v338_v57  ;;  %v357_v57 = vunpack.c.l.bf16 %v355_v55 }
  0x3c   : > { %v330_v3 = vmul.f32 %v705_v26, %v329_v59  ;;  %v471_v54 = vpack.c.bf16 %v448_v52, %v447_v51 }
  0x3d   : > { %v340_v4 = vmul.f32 %v707_v31, %v339_v63  ;;  %v359_v63 = vunpack.c.l.bf16 %v356_v60 }
  0x3e   : > { %v334_v5 = vsel %vm333_vm4, %v705_v26, %v330_v3  ;;  %v404_v26 = vld [vmem:[%s1063_s3 + $0x28] sm:$0xff] }
  0x3f   : > { %346 = vst.msk [vmem:[#allocation3] sm:$0xff] %vm345_vm5, %v334_v5  ;;  %v348_v8 = vmul.f32 %v334_v5, %v893_v6  ;;  %v344_v10 = vsel %vm343_vm6, %v707_v31, %v340_v4  ;;  %v405_v6 = vld [vmem:[%s1063_s3 + $0x30] sm:$0xff]  ;;  %v436_v29 = vand.u32 2147483647, %v404_v26  ;;  %v451_v31 = vand.u32 2147483647, %v419_v27 }
  0x40   : > { %347 = vst.msk [vmem:[#allocation3 + $0x8] sm:$0xff] %vm345_vm5, %v344_v10  ;;  %v349_v12 = vmul.f32 %v344_v10, %v898_v9  ;;  %v406_v9 = vld [vmem:[%s1063_s3 + $0x38] sm:$0xff]  ;;  %v437_v18 = vand.u32 2147483647, %v405_v6  ;;  %v789_v6 = vmov 0.0   ;;  %v519_v27 = vld [vmem:[%s1064_s4] sm:$0xff] }
  0x41   : > { %350 = vst.msk [vmem:[#allocation4] sm:$0xff] %vm345_vm5, %v348_v8  ;;  %v438_v19 = vand.u32 2147483647, %v406_v9  ;;  %v465_v33 = vpack.c.bf16 %v436_v29, %v435_v28  ;;  %v473_v34 = vpack.c.bf16 %v452_v32, %v451_v31  ;;  %v520_v28 = vld [vmem:[%s1064_s4 + $0x8] sm:$0xff] }
  0x42   : > { %351 = vst.msk [vmem:[#allocation4 + $0x8] sm:$0xff] %vm345_vm5, %v349_v12 }
  0x43   : > { %v466_v23 = vpack.c.bf16 %v438_v19, %v437_v18  ;;  %500 = vmatpush.bf16.msra.mxu1 %v473_v34  ;;  %353 = vst.msk [vmem:[#allocation2] sm:$0xff] %vm352_vm7, %v789_v6 }
  0x44   : > { %354 = vst.msk [vmem:[#allocation2 + $0x8] sm:$0xff] %vm352_vm7, %v789_v6 }
  0x45   : > { %485 = vmatpush.bf16.msra.mxu0 %v466_v23 }
  0x46   : > { %v361_v13 = vld [vmem:[#allocation3] sm:$0xff] }
  0x47   : > { %365 = vperm.xlu0 %702, %v361_v13   ;;  %v362_v15 = vld [vmem:[#allocation3 + $0x8] sm:$0xff]  ;;  %501 = vmatpush.bf16.msra.mxu1 %v472_v44 }
  0x48   : > { %v377_v14 = vld [vmem:[#allocation4] sm:$0xff] }
  0x49   : > { %381 = vperm.xlu1 %703, %v377_v14   ;;  %v378_v16 = vld [vmem:[#allocation4 + $0x8] sm:$0xff]  ;;  %486 = vmatpush.bf16.msra.mxu0 %v465_v33 }
  0x4a   : > { %v479_v17 = vld [vmem:[#allocation2] sm:$0xff] }
  0x4b   : > { %502 = vmatpush.bf16.msra.mxu1 %v471_v54  ;;  %v480_v22 = vld [vmem:[#allocation2 + $0x8] sm:$0xff] }
  0x4d   : > { %487 = vmatpush.bf16.msra.mxu0 %v464_v43 }
  0x4f   : > { %370 = vperm.xlu0 %702, %v362_v15  }
  0x51   : > { %386 = vperm.xlu1 %703, %v378_v16   ;;  %488 = vmatpush.bf16.msra.mxu0 %v463_v53 }
  0xb9   : > { %v366_v56 = vpop.permute.xlu0 %365 }
  0xba   : > { %v373_v61 = vmul.f32 %v366_v56, %v357_v57  ;;  %v374_v62 = vmul.f32 %v366_v56, %v358_v58 }
  0xbb   : > { %v382_v59 = vpop.permute.xlu1 %381 }
  0xbc   : > { %v389_v2 = vsub.f32 %v373_v61, %v382_v59  ;;  %v390_v3 = vsub.f32 %v374_v62, %v382_v59 }
  0xbe   : > { %v393_v11 = vmax.f32 %v389_v2, 0.0  ;;  %v394_v12 = vmax.f32 %v390_v3, 0.0 }
  0xc1   : > { %v371_v1 = vpop.permute.xlu0 %370 }
  0xc2   : > { %v375_v4 = vmul.f32 %v371_v1, %v359_v63  ;;  %v376_v5 = vmul.f32 %v371_v1, %v360_v0 }
  0xc3   : > { %v387_v7 = vpop.permute.xlu1 %386 }
  0xc4   : > { %v391_v8 = vsub.f32 %v375_v4, %v387_v7  ;;  %v392_v10 = vsub.f32 %v376_v5, %v387_v7 }
  0xc6   : > { %v395_v13 = vmax.f32 %v391_v8, 0.0  ;;  %v396_v14 = vmax.f32 %v392_v10, 0.0 }
  0xc8   : > { %v397_v15 = vpack.c.bf16 %v395_v13, %v393_v11  ;;  %v398_v16 = vpack.c.bf16 %v396_v14, %v394_v12 }
  0xca   : > { %489 = vmatmul.bf16.vlgmr.msra.gmra.mxu0 %v397_v15  ;;  %503 = vmatmul.bf16.vlgmr.msra.gmra.mxu1 %v398_v16 }
 0x147   : > { %v490_v9 = vpop.f32.mrf.mxu0  ;;  %v504_v18 = vpop.f32.mrf.mxu1 }
 0x148   : > { %v505_v19 = vadd.f32 %v504_v18, %v490_v9 }
 0x14a   : > { %v509_v20 = vadd.f32 %v505_v19, %v479_v17 }
 0x14c   : > { %512 = vst.msk [vmem:[#allocation2] sm:$0xff] %vm352_vm7, %v509_v20 }
 0x14f   : > { %v492_v21 = vpop.f32.mrf.mxu0  ;;  %v506_v23 = vpop.f32.mrf.mxu1 }
 0x150   : > { %v507_v24 = vadd.f32 %v506_v23, %v492_v21 }
 0x152   : > { %v510_v25 = vadd.f32 %v507_v24, %v480_v22 }
 0x153   : > { %v517_v26 = vld [vmem:[#allocation2] sm:$0xff] }
 0x154   : > { %513 = vst.msk [vmem:[#allocation2 + $0x8] sm:$0xff] %vm352_vm7, %v510_v25  ;;  %v521_v29 = vmul.f32 %v519_v27, %v517_v26 }
 0x156   : > { %v523_v32 = vsel %vm352_vm7, %v521_v29, 0.0 }
 0x15b   : > { %v518_v30 = vld [vmem:[#allocation2 + $0x8] sm:$0xff] }
 0x15c   : > { %v522_v31 = vmul.f32 %v520_v28, %v518_v30 }
 0x15e   : > { %v524_v33 = vsel %vm352_vm7, %v522_v31, 0.0 }
 0x15f   : > { %v525_v34 = vadd.f32 %v524_v33, %v523_v32 }
 0x161   : > { %v526_v35 = vrot.slane %v525_v34, 4 }
 0x163   : > { %v527_v36 = vadd.f32 %v526_v35, %v525_v34 }
 0x165   : > { %v528_v37 = vrot.slane %v527_v36, 2 }
 0x167   : > { %v529_v38 = vadd.f32 %v528_v37, %v527_v36 }
 0x169   : > { %v530_v39 = vrot.slane %v529_v38, 1 }
 0x16b   : > { %v531_v40 = vadd.f32 %v530_v39, %v529_v38 }
 0x16d   : > { %533 = vst.msk [vmem:[%s292_s29] sm:$0x1] %vm532_vm8, %v531_v40 }
 0x16e   : > { %735 = shalt.err (!%p732_p7)
}
 0x16f   : > { %645 = dma.vmem_to_hbm [thread:$0]  (%p859_p5), %s546_s7, 16, %s548_s8, %s535_s9  }
 0x170 PF: > { %s559_s11 = sand.u32 1, %s766_s18   ;;  %p648_p8 = pnand %p636_p10, %p870_p9 }
 0x171   : > { %s560_s17 = scalar_lea.sflag [#allocation7], %s559_s11 }
 0x172   : > { %p649_p11 = pneg %p648_p8 }
 0x174   : > { %761 = dma.done.wait (%p649_p11), %s560_s17, 16  }
 0x175   : > { %763 = vsyncadd (%p649_p11), %s560_s17, 4294967280  ;;  %s18_s23 = sadd.s32 1, %s786_s23   ;;  %s1068_s18 = smov %s770_s19 }
 0x176   : > { %p15_p12 = scmp.ge.s32.totalorder %s18_s23, 4   ;;  %s1069_s19 = smov %s774_s20 }
 0x177   : > { %s1070_s20 = smov %s868_s30  ;;  %s1071_s21 = smov %s782_s22 }
 0x178   : > { %s1072_s22 = smov %s1074_s26  ;;  %17 = sbr.rel (!%p15_p12) target bundleno = 4 (0x4), region = 129 }
 0x17d   :  { %565 = vsyncpa [#allocation7], 1 }
 0x17e   :  { %567 = vsyncpa [#allocation7 + $0x1], 1 }

</bundles_post_ra>
